<compile_context>
chip_gen: v5e
topology: v5e:2x2
jax: 0.10.0
libtpu: 0.0.40
codegen_flags: <defaults>
</compile_context>

<pallas_src>
import functools

import jax
import jax.numpy as jnp
from jax.experimental import pallas as pl
from jax.experimental.pallas import tpu as pltpu


def _round_up(n: int, m: int) -> int:
    return ((n + m - 1) // m) * m


def _sublanes_for_dtype(dtype) -> int:
    # f32 -> 8 sublanes, bf16/f16 -> 16, int8/fp8 -> 32 (sublane packing).
    itemsize = jnp.dtype(dtype).itemsize
    return 8 * max(1, 4 // itemsize)


def _pick_tile_rows(n_rows_padded: int, d_padded: int, dtype,
                    target_block_bytes: int = 4 << 20,
                    max_rows: int = 1024) -> int:
    """Largest row tile (multiple of the sublane count) within the block budget."""
    itemsize = jnp.dtype(dtype).itemsize
    sub = _sublanes_for_dtype(dtype)
    rows = target_block_bytes // max(1, d_padded * itemsize)
    rows = max(sub, min(rows, max_rows))
    rows = (rows // sub) * sub
    rows = max(sub, rows)
    return min(rows, n_rows_padded)


def _project_kernel(center_ref, x_ref, o_ref, *, radius, eps):
    # center_ref: (1, Dp), x_ref/o_ref: (TM, Dp). Padded lanes are zero in both
    # x and center, so they contribute nothing to the norm and produce zeros in
    # the output (sliced off in the wrapper).
    c = center_ref[...].astype(jnp.float32)            # (1, Dp)
    x = x_ref[...].astype(jnp.float32)                 # (TM, Dp)
    diff = x - c                                       # VPU, broadcast rows
    sq = jnp.sum(diff * diff, axis=-1, keepdims=True)  # XLU cross-lane reduce
    inv_norm = jax.lax.rsqrt(jnp.maximum(sq, eps))     # EUP rsqrt, eps-clamped
    scale = radius * inv_norm                          # (TM, 1): one scale/row
    o_ref[...] = (c + diff * scale).astype(o_ref.dtype)


def project_to_sphere(sphere_center, sphere_radius, x, *, eps=1e-12):
    """Pallas implementation of project_to_sphere.

    sphere_center: (D,) float array
    sphere_radius: python float
    x:             (..., D) float array
    returns:       same shape/dtype as x, projected onto the sphere surface
    """
    orig_shape = x.shape
    D = orig_shape[-1]
    x2d = x.reshape(-1, D)
    N = x2d.shape[0]
    dtype = x2d.dtype
    itemsize = jnp.dtype(dtype).itemsize

    # Lane-dense feature dim (multiple of 128); zero padding keeps the norm exact.
    D_pad = _round_up(max(D, 1), 128)

    sub = _sublanes_for_dtype(dtype)
    N_sub = _round_up(max(N, 1), sub)
    tile_rows = _pick_tile_rows(N_sub, D_pad, dtype)
    N_pad = _round_up(max(N, 1), tile_rows)
    grid_rows = N_pad // tile_rows  # == pl.cdiv(N, tile_rows) after padding

    # Pad inputs in the wrapper (cheap, one-time) so the kernel sees aligned tiles.
    xp = jnp.pad(x2d, ((0, N_pad - N), (0, D_pad - D)))
    center2d = jnp.pad(sphere_center.astype(dtype).reshape(1, D),
                       ((0, 0), (0, D_pad - D)))

    # VMEM: 2x double-buffered (input block + output block) + resident center.
    block_bytes = tile_rows * D_pad * itemsize
    center_bytes = 2 * D_pad * itemsize
    vmem_est = 4 * block_bytes + center_bytes
    vmem_limit = min(48 << 20, max(32 << 20, int(vmem_est * 1.5)))

    kernel = functools.partial(_project_kernel,
                               radius=float(sphere_radius),
                               eps=float(eps))

    out = pl.pallas_call(
        kernel,
        out_shape=jax.ShapeDtypeStruct((N_pad, D_pad), dtype),
        grid_spec=pltpu.PrefetchScalarGridSpec(
            num_scalar_prefetch=0,
            grid=(grid_rows,),
            in_specs=[
                pl.BlockSpec((1, D_pad), lambda i: (0, 0)),           # center (resident)
                pl.BlockSpec((tile_rows, D_pad), lambda i: (i, 0)),   # x row tile
            ],
            out_specs=pl.BlockSpec((tile_rows, D_pad), lambda i: (i, 0)),
        ),
        compiler_params=pltpu.CompilerParams(
            dimension_semantics=("parallel",),
            vmem_limit_bytes=vmem_limit,
        ),
    )(center2d, xp)

    return out[:N, :D].reshape(orig_shape)


if __name__ == "__main__":
    key = jax.random.PRNGKey(0)
    k_center, k_x = jax.random.split(key)

    N, D = 16, 64
    sphere_radius = 2.5
    sphere_center = jax.random.normal(k_center, (D,), dtype=jnp.float32)
    x = jax.random.normal(k_x, (N, D), dtype=jnp.float32) * 3.0 + 1.0

    y = project_to_sphere(sphere_center, sphere_radius, x)
    y = jax.block_until_ready(y)

    # Reference check in plain JAX (same eps-clamped formula).
    diff = x - sphere_center[None, :]
    sq = jnp.sum(diff * diff, axis=-1, keepdims=True)
    inv = jax.lax.rsqrt(jnp.maximum(sq, 1e-12))
    y_ref = sphere_center[None, :] + sphere_radius * diff * inv
    assert jnp.allclose(y, y_ref, atol=1e-5, rtol=1e-5), "mismatch vs reference"

    # Sanity: all outputs lie on the sphere (distance to center == radius).
    dists = jnp.linalg.norm(y - sphere_center[None, :], axis=-1)
    assert jnp.allclose(dists, sphere_radius, atol=1e-4), "not on sphere"

    # Degenerate input: a point exactly at the center must not produce NaN.
    x_deg = x.at[0].set(sphere_center)
    y_deg = jax.block_until_ready(project_to_sphere(sphere_center, sphere_radius, x_deg))
    assert not bool(jnp.any(jnp.isnan(y_deg))), "NaN for point at center"

    print("KERNEL_OK")
</pallas_src>

<mosaic_0001>
module attributes {stable_mosaic.version = 11 : i64} {
  func.func @_project_kernel(%arg0: i32, %arg1: memref<1x128xf32, #tpu.memory_space<vmem>>, %arg2: memref<16x128xf32, #tpu.memory_space<vmem>>, %arg3: memref<16x128xf32, #tpu.memory_space<vmem>>) attributes {dimension_semantics = [#tpu.dimension_semantics<parallel>], iteration_bounds = array<i64: 1>, scalar_prefetch = 0 : i64, scratch_operands = 0 : i64, tpu.core_type = #tpu.core_type<tc>, window_params = [{pipeline_mode = #tpu.pipeline_mode<synchronous>, transform_indices = @transform_0, window_bounds = array<i64: 1, 128>}, {transform_indices = @transform_1, window_bounds = array<i64: 16, 128>}, {transform_indices = @transform_2, window_bounds = array<i64: 16, 128>}]} {
    %c0 = arith.constant 0 : index
    %c0_0 = arith.constant 0 : index
    %0 = vector.load %arg1[%c0, %c0_0] : memref<1x128xf32, #tpu.memory_space<vmem>>, vector<1x128xf32>
    %c0_1 = arith.constant 0 : index
    %c0_2 = arith.constant 0 : index
    %1 = vector.load %arg2[%c0_1, %c0_2] : memref<16x128xf32, #tpu.memory_space<vmem>>, vector<16x128xf32>
    %2 = vector.broadcast %0 : vector<1x128xf32> to vector<16x128xf32>
    %3 = arith.subf %1, %2 : vector<16x128xf32>
    %4 = arith.mulf %3, %3 : vector<16x128xf32>
    %cst = arith.constant dense<0.000000e+00> : vector<16xf32>
    %5 = vector.multi_reduction <add>, %4, %cst [1] : vector<16x128xf32> to vector<16xf32>
    %6 = vector.shape_cast %5 : vector<16xf32> to vector<16x1xf32>
    %cst_3 = arith.constant 9.99999996E-13 : f32
    %7 = vector.broadcast %cst_3 : f32 to vector<16x1xf32>
    %8 = arith.maximumf %6, %7 : vector<16x1xf32>
    %9 = math.rsqrt %8 : vector<16x1xf32>
    %cst_4 = arith.constant 2.500000e+00 : f32
    %10 = vector.broadcast %cst_4 : f32 to vector<16x1xf32>
    %11 = arith.mulf %10, %9 : vector<16x1xf32>
    %12 = vector.broadcast %11 : vector<16x1xf32> to vector<16x128xf32>
    %13 = arith.mulf %3, %12 : vector<16x128xf32>
    %14 = vector.broadcast %0 : vector<1x128xf32> to vector<16x128xf32>
    %15 = arith.addf %14, %13 : vector<16x128xf32>
    %c0_5 = arith.constant 0 : index
    %c0_6 = arith.constant 0 : index
    %16 = vector.load %arg3[%c0_5, %c0_6] : memref<16x128xf32, #tpu.memory_space<vmem>>, vector<16x128xf32>
    tpu.vector_store %arg3[%c0_5, %c0_6], %15 {strides = array<i32>} : memref<16x128xf32, #tpu.memory_space<vmem>>, vector<16x128xf32>,
    return
  }
  func.func @transform_0(%arg0: i32) -> (i32, i32) {
    %c0_i32 = arith.constant 0 : i32
    %c0_i32_0 = arith.constant 0 : i32
    %c0_i32_1 = arith.constant 0 : i32
    return %c0_i32, %c0_i32_0 : i32, i32
  }
  func.func @transform_1(%arg0: i32) -> (i32, i32) {
    %c0_i32 = arith.constant 0 : i32
    %c0_i32_0 = arith.constant 0 : i32
    return %arg0, %c0_i32 : i32, i32
  }
  func.func @transform_2(%arg0: i32) -> (i32, i32) {
    %c0_i32 = arith.constant 0 : i32
    %c0_i32_0 = arith.constant 0 : i32
    return %arg0, %c0_i32 : i32, i32
  }
}

</mosaic_0001>

<bundles_post_ra>
// kernel: tpu_custom_call.1
= control target key start
LH: loop header
LB: loop body
LE: loop exit
PB: predicated region body
PF: predicated region fallthrough
CT: control target
= control target key end

     0   :  { %7 = vsyncpa [#allocation3], 0  ;;  %s229_s0 = inlined_call_operand.hbm [shape: f32[1,128], index: 0, kind: input, shape index: {}]   ;;  %s230_s1 = inlined_call_operand.hbm [shape: f32[16,128], index: 1, kind: input, shape index: {}]   ;;  %s231_s2 = inlined_call_operand.hbm [shape: f32[16,128], index: 2, kind: output, shape index: {}]  }
   0x1   :  { %8 = vsyncpa [#allocation6], 0 }
   0x2   :  { %9 = vsyncpa [#allocation4], 0  ;;  %s15_s11 = sshll.u32 %s229_s0, 4  ;;  %s194_s12 = smov [#allocation2]   ;;  %s16_s11 = int_to_ptr.hbm [resolvable:$true] %s15_s11 }
   0x3   :  { %s17_s13 = sshll.u32 %s194_s12, 4  ;;  %s25_s16 = sshll.u32 %s230_s1, 4  ;;  %s18_s13 = int_to_ptr.vmem [resolvable:$true] %s17_s13  ;;  %s26_s16 = int_to_ptr.hbm [resolvable:$true] %s25_s16 }
   0x4   :  { %20 = dma.hbm_to_vmem [thread:$0]  %s16_s11, 16, %s18_s13, [#allocation3]  }
   0x5   :  { %s195_s17 = smov [#allocation5]   ;;  %s196_s19 = smov 128  }
   0x6   :  { %s27_s18 = sshll.u32 %s195_s17, 4  ;;  %s197_s20 = smov 8   ;;  %s28_s18 = int_to_ptr.vmem [resolvable:$true] %s27_s18 }
   0x7   :  { %33 = dma.hbm_to_vmem [thread:$0]  %s26_s16, 256, %s28_s18, [#allocation6], %s196_s19, %s196_s19, %s197_s20  }
   0x8   :  { %188 = dma.done.wait [#allocation3], 16  }
   0x9   :  { %189 = vsyncadd [#allocation3], 4294967280 }
   0xa   :  { %190 = dma.done.wait [#allocation6], 256  }
   0xb   :  { %191 = vsyncadd [#allocation6], 4294967040  ;;  %v43_v0 = vld [vmem:[#allocation5] sm:$0xff]  ;;  %v111_v1 = vld [vmem:[#allocation2] ss:$0 sm:$0xff]  ;;  %s198_s0 = smov [#allocation7]  }
   0xc   :  { %v48_v2 = vsub.f32 %v43_v0, %v111_v1  ;;  %v44_v3 = vld [vmem:[#allocation5 + $0x8] sm:$0xff]  ;;  %s90_s1 = sshll.u32 %s198_s0, 4  ;;  %s92_s23 = sshll.u32 %s231_s2, 4  ;;  %s91_s1 = int_to_ptr.vmem [resolvable:$true] %s90_s1  ;;  %s93_s23 = int_to_ptr.hbm [resolvable:$true] %s92_s23 }
   0xd   :  { %v49_v5 = vsub.f32 %v44_v3, %v111_v1 }
   0xe   :  { %v50_v4 = vmul.f32 %v48_v2, %v48_v2 }
   0xf   :  { %v51_v6 = vmul.f32 %v49_v5, %v49_v5 }
  0x10   :  { %52 = vadd.xlane.f32.xlu0 %v50_v4 }
  0x18   :  { %54 = vadd.xlane.f32.xlu0 %v51_v6 }
  0x83   :  { %v53_v7 = vpop.xlane.xlu0 %52 }
  0x84   :  { %v56_v8 = vmax.f32 %v53_v7, 1e-12 }
  0x86   :  { %112 = vrsqrt.f32 %v56_v8  ;;  %vm64_vm1 = vweird.f32 %v56_v8 }
  0x8b   :  { %v55_v9 = vpop.xlane.xlu0 %54 }
  0x8c   :  { %v113_v10 = vpop.eup %112  ;;  %v57_v11 = vmax.f32 %v55_v9, 1e-12 }
  0x8d   :  { %v59_v12 = vmul.f32 %v113_v10, %v56_v8  ;;  %vm65_vm0 = vweird.f32 %v113_v10 }
  0x8e   :  { %114 = vrsqrt.f32 %v57_v11  ;;  %vm66_vm2 = vmor %vm64_vm1, %vm65_vm0  ;;  %vm74_vm4 = vweird.f32 %v57_v11 }
  0x8f   :  { %v60_v13 = vmul.f32 %v113_v10, %v59_v12 }
  0x91   :  { %v61_v14 = vmul.f32 0.5, %v60_v13 }
  0x93   :  { %v62_v15 = vsub.f32 1.5, %v61_v14 }
  0x94   :  { %v115_v16 = vpop.eup %114 }
  0x95   :  { %v63_v17 = vmul.f32 %v113_v10, %v62_v15  ;;  %v69_v18 = vmul.f32 %v115_v16, %v57_v11  ;;  %vm75_vm3 = vweird.f32 %v115_v16 }
  0x96   :  { %vm76_vm5 = vmor %vm74_vm4, %vm75_vm3 }
  0x97   :  { %v67_v19 = vsel %vm66_vm2, %v113_v10, %v63_v17  ;;  %v70_v20 = vmul.f32 %v115_v16, %v69_v18 }
  0x98   :  { %v78_v21 = vmul.f32 2.5, %v67_v19 }
  0x99   :  { %v71_v22 = vmul.f32 0.5, %v70_v20 }
  0x9a   :  { %v80_v23 = vmul.f32 %v78_v21, %v48_v2 }
  0x9b   :  { %v72_v24 = vsub.f32 1.5, %v71_v22 }
  0x9c   :  { %v82_v25 = vadd.f32 %v111_v1, %v80_v23 }
  0x9d   :  { %v73_v26 = vmul.f32 %v115_v16, %v72_v24 }
  0x9e   :  { %84 = vst [vmem:[#allocation7] sm:$0xff] %v82_v25 }
  0x9f   :  { %v77_v27 = vsel %vm76_vm5, %v115_v16, %v73_v26 }
  0xa0   :  { %v79_v28 = vmul.f32 2.5, %v77_v27 }
  0xa2   :  { %v81_v29 = vmul.f32 %v79_v28, %v49_v5 }
  0xa4   :  { %v83_v30 = vadd.f32 %v111_v1, %v81_v29 }
  0xa6   :  { %85 = vst [vmem:[#allocation7 + $0x8] sm:$0xff] %v83_v30 }
  0xa7   :  { %98 = dma.vmem_to_hbm [thread:$0]  %s91_s1, 256, %s93_s23, [#allocation4], %s196_s19, %s196_s19, %s197_s20  }
  0xa8   :  { %192 = dma.done.wait [#allocation4], 256  }
  0xa9   :  { %193 = vsyncadd [#allocation4], 4294967040 }
  0xaa   :  { %103 = vsyncpa [#allocation3], 1 }
  0xab   :  { %104 = vsyncpa [#allocation6], 1 }
  0xac   :  { %105 = vsyncpa [#allocation4], 1 }

</bundles_post_ra>
